<compile_context>
chip_gen: v7x
topology: tpu7x:2x2x1
jax: 0.10.0
libtpu: 0.0.40
codegen_flags: <defaults>
</compile_context>

<pallas_src>
import functools

import jax
import jax.numpy as jnp
from jax.experimental import pallas as pl
from jax.experimental.pallas import tpu as pltpu


def _round_up(x, m):
    return (x + m - 1) // m * m


def _device_config():
    """Generation-aware (tm target, VMEM cap, #TensorCores per chip)."""
    try:
        kind = jax.devices()[0].device_kind.lower()
    except Exception:
        kind = ""
    if "v5" in kind or "v6" in kind:
        # 128 MiB VMEM, single TensorCore: big M tiles amortize per-step overhead.
        return 2048, 100 << 20, 1
    # v7x / unknown: 64 MiB VMEM per TC, 2 TCs per chip -> stay conservative.
    return 512, 56 << 20, 2


def patch_embed_kernel(p_ref, w_ref, b_ref, o_ref):
    """One (tm, N) output block: a single MXU pass against the resident weight."""
    o_ref[...] = (
        jnp.dot(p_ref[...], w_ref[...], preferred_element_type=jnp.float32)
        + b_ref[...]
    ).astype(o_ref.dtype)


def _patch_gemm_bias(patches, w_mat, bias, out_dtype):
    """patches [M, K] @ w_mat [K, N] + bias; 1-D grid over M, K/N fully resident."""
    M, K = patches.shape
    N = w_mat.shape[1]
    out_itemsize = jnp.dtype(out_dtype).itemsize

    tm_target, vmem_cap, n_cores = _device_config()

    tm = min(tm_target, _round_up(M, 16))
    if tm >= M:
        tm = M                       # one full-M block (exempt from 16-alignment rule)
        if n_cores > 1 and M >= 32:
            # Ensure >= 2 parallel M blocks so both v7x TensorCores are used.
            tm = _round_up((M + 1) // 2, 16)

    def _vmem_need(t):
        return (2 * t * K * 2            # double-buffered bf16 patch blocks
                + 2 * K * N * 2          # resident bf16 weight (2x budgeted, DMA'd once)
                + 2 * N * 4              # resident f32 bias
                + 2 * t * N * out_itemsize)  # double-buffered output blocks

    # Shrink tm if the resident-W + pipelined blocks would overshoot the budget
    # (matters for v7x's 64 MiB TC with patch32 / large hidden).
    while _vmem_need(tm) + (4 << 20) > vmem_cap and tm > 16:
        tm = max(16, _round_up(tm // 2, 16))

    vmem_limit = int(min(max(_vmem_need(tm) + (4 << 20), 16 << 20), vmem_cap))

    cost = pl.CostEstimate(
        flops=2 * M * K * N,
        transcendentals=0,
        bytes_accessed=M * K * 2 + K * N * 2 + N * 4 + M * N * out_itemsize,
    )

    b = bias.astype(jnp.float32).reshape(1, N)

    return pl.pallas_call(
        patch_embed_kernel,
        out_shape=jax.ShapeDtypeStruct((M, N), out_dtype),
        grid_spec=pltpu.PrefetchScalarGridSpec(
            num_scalar_prefetch=0,
            grid=(pl.cdiv(M, tm),),           # ragged tail block clipped by Pallas
            in_specs=[
                pl.BlockSpec((tm, K), lambda i: (i, 0)),   # patch stream, read once
                pl.BlockSpec((K, N), lambda i: (0, 0)),    # resident weight
                pl.BlockSpec((1, N), lambda i: (0, 0)),    # resident bias
            ],
            out_specs=pl.BlockSpec((tm, N), lambda i: (i, 0)),
        ),
        compiler_params=pltpu.CompilerParams(
            dimension_semantics=("parallel",),
            vmem_limit_bytes=vmem_limit,
        ),
        cost_estimate=cost,
    )(patches, w_mat, b)


@functools.partial(jax.jit, static_argnames=("patch_size", "flatten_tokens"))
def patch_embeddings_pallas(x, weight, bias, *, patch_size, flatten_tokens=False):
    """x: [B, C, H, W] (NCHW). weight: [hidden, C, P, P] (Conv2d OIHW). bias: [hidden]."""
    B, C, H, W = x.shape
    P = patch_size
    hidden = weight.shape[0]
    Hp, Wp = H // P, W // P
    n_patches = Hp * Wp

    # Cast to bf16 BEFORE the layout work so the one materialized patch
    # transpose moves half the bytes (XLA fuses the convert into the copy).
    xb = x.astype(jnp.bfloat16)
    patches = xb.reshape(B, C, Hp, P, Wp, P)
    patches = patches.transpose(0, 2, 4, 1, 3, 5)           # [B, Hp, Wp, C, P, P]
    patches = patches.reshape(B * n_patches, C * P * P)     # [M, K], (C, kh, kw) order

    # Conv2d weight [hidden, C, P, P] (OIHW) -> [K, N], bf16.
    w_mat = weight.astype(jnp.bfloat16).reshape(hidden, C * P * P).T

    out = _patch_gemm_bias(patches, w_mat, bias, jnp.bfloat16)   # [M, hidden] bf16

    if flatten_tokens:
        # ViT consumers flatten to tokens immediately; skip the NCHW transpose.
        return out.reshape(B, n_patches, hidden).astype(x.dtype)

    # Conv2d's NCHW output contract: the transpose reads bf16 and the upcast
    # back to x.dtype fuses into the same copy.
    out = out.reshape(B, Hp, Wp, hidden).transpose(0, 3, 1, 2)
    return out.astype(x.dtype)


def embeddings_forward(x, weight, bias, patch_size):
    """Mirrors Embeddings.forward (hybrid=False): returns (patch_embeddings(x), None)."""
    # TODO(synk): hybrid=True path (ResNetV2 backbone + skip features) not implemented.
    features = None
    return patch_embeddings_pallas(x, weight, bias, patch_size=patch_size), features


if __name__ == "__main__":
    # Small shapes consistent with the module:
    #   img_size=16, patch size=4 -> n_patches = (16/4)*(16/4) = 16
    #   in_channels=4, hidden_size=32, batch=2
    B, C, H, W = 2, 4, 16, 16
    P = 4
    hidden = 32

    key = jax.random.PRNGKey(0)
    kx, kw, kb = jax.random.split(key, 3)
    x = jax.random.normal(kx, (B, C, H, W), dtype=jnp.float32)
    weight = jax.random.normal(kw, (hidden, C, P, P), dtype=jnp.float32) * 0.02
    bias = jax.random.normal(kb, (hidden,), dtype=jnp.float32) * 0.02

    out, features = embeddings_forward(x, weight, bias, P)
    out = jax.block_until_ready(out)
    assert out.shape == (B, hidden, H // P, W // P)
    assert out.dtype == x.dtype
    assert features is None

    # Reference: plain-JAX strided conv (same semantics as Conv2d).
    ref = jax.lax.conv_general_dilated(
        x, weight, window_strides=(P, P), padding="VALID",
        dimension_numbers=("NCHW", "OIHW", "NCHW"),
    ) + bias.reshape(1, hidden, 1, 1)
    # bf16 operands + bf16 store (f32 accumulate) -> loosened tolerance.
    err = float(jnp.max(jnp.abs(out - ref)))
    assert jnp.allclose(out, ref, atol=2e-2, rtol=2e-2), err

    print("KERNEL_OK")
</pallas_src>

<mosaic_0001>
module attributes {stable_mosaic.version = 11 : i64} {
  func.func @patch_embed_kernel(%arg0: i32, %arg1: memref<16x64xbf16, #tpu.memory_space<vmem>>, %arg2: memref<64x32xbf16, #tpu.memory_space<vmem>>, %arg3: memref<1x32xf32, #tpu.memory_space<vmem>>, %arg4: memref<16x32xbf16, #tpu.memory_space<vmem>>) attributes {dimension_semantics = [#tpu.dimension_semantics<parallel>], iteration_bounds = array<i64: 2>, scalar_prefetch = 0 : i64, scratch_operands = 0 : i64, tpu.core_type = #tpu.core_type<tc>, window_params = [{transform_indices = @transform_0, window_bounds = array<i64: 16, 64>}, {pipeline_mode = #tpu.pipeline_mode<synchronous>, transform_indices = @transform_1, window_bounds = array<i64: 64, 32>}, {pipeline_mode = #tpu.pipeline_mode<synchronous>, transform_indices = @transform_2, window_bounds = array<i64: 1, 32>}, {transform_indices = @transform_3, window_bounds = array<i64: 16, 32>}]} {
    %c0 = arith.constant 0 : index
    %c0_0 = arith.constant 0 : index
    %0 = vector.load %arg1[%c0, %c0_0] : memref<16x64xbf16, #tpu.memory_space<vmem>>, vector<16x64xbf16>
    %c0_1 = arith.constant 0 : index
    %c0_2 = arith.constant 0 : index
    %1 = vector.load %arg2[%c0_1, %c0_2] : memref<64x32xbf16, #tpu.memory_space<vmem>>, vector<64x32xbf16>
    %cst = arith.constant dense<0.000000e+00> : vector<16x32xf32>
    %2 = tpu.matmul %0, %1, %cst {dimension_numbers = #tpu.dot_dimension_numbers<[1], [0], [0], [1], [0, 0, 1, 1], [], []>} : vector<16x64xbf16>, vector<64x32xbf16>, vector<16x32xf32> -> vector<16x32xf32>
    %c0_3 = arith.constant 0 : index
    %c0_4 = arith.constant 0 : index
    %3 = vector.load %arg3[%c0_3, %c0_4] : memref<1x32xf32, #tpu.memory_space<vmem>>, vector<1x32xf32>
    %4 = vector.broadcast %3 : vector<1x32xf32> to vector<16x32xf32>
    %5 = arith.addf %2, %4 : vector<16x32xf32>
    %6 = arith.truncf %5 : vector<16x32xf32> to vector<16x32xbf16>
    %c0_5 = arith.constant 0 : index
    %c0_6 = arith.constant 0 : index
    %7 = vector.load %arg4[%c0_5, %c0_6] : memref<16x32xbf16, #tpu.memory_space<vmem>>, vector<16x32xbf16>
    tpu.vector_store %arg4[%c0_5, %c0_6], %6 {strides = array<i32>} : memref<16x32xbf16, #tpu.memory_space<vmem>>, vector<16x32xbf16>,
    return
  }
  func.func @transform_0(%arg0: i32) -> (i32, i32) {
    %c0_i32 = arith.constant 0 : i32
    %c0_i32_0 = arith.constant 0 : i32
    return %arg0, %c0_i32 : i32, i32
  }
  func.func @transform_1(%arg0: i32) -> (i32, i32) {
    %c0_i32 = arith.constant 0 : i32
    %c0_i32_0 = arith.constant 0 : i32
    %c0_i32_1 = arith.constant 0 : i32
    return %c0_i32, %c0_i32_0 : i32, i32
  }
  func.func @transform_2(%arg0: i32) -> (i32, i32) {
    %c0_i32 = arith.constant 0 : i32
    %c0_i32_0 = arith.constant 0 : i32
    %c0_i32_1 = arith.constant 0 : i32
    return %c0_i32, %c0_i32_0 : i32, i32
  }
  func.func @transform_3(%arg0: i32) -> (i32, i32) {
    %c0_i32 = arith.constant 0 : i32
    %c0_i32_0 = arith.constant 0 : i32
    return %arg0, %c0_i32 : i32, i32
  }
}

</mosaic_0001>

<bundles_post_ra>
// kernel: patch_embeddings_pallas.1
= control target key start
LH: loop header
LB: loop body
LE: loop exit
PB: predicated region body
PF: predicated region fallthrough
CT: control target
= control target key end

     0   :  { %s417_s12 = smov 0   ;;  %s449_s0 = inlined_call_operand.vmem [shape: bf16[32,64], index: 0, kind: input, shape index: {}]   ;;  %s450_s1 = inlined_call_operand.vmem [shape: bf16[64,32], index: 1, kind: input, shape index: {}]   ;;  %s451_s2 = inlined_call_operand.vmem [shape: f32[1,32], index: 2, kind: input, shape index: {}]   ;;  %s452_s3 = inlined_call_operand.vmem [shape: bf16[32,32], index: 3, kind: output, shape index: {}]  }
   0x1 LB: > { %s333_s13 = sadd.s32 4294967295, %s393_s12   ;;  %p337_p0 = scmp.ge.s32.totalorder %s393_s12, 1  ;;  %s393_s12 = sphi %s417_s12, %s13_s12  }
   0x2   : > { %p138_p1 = scmp.lt.s32.totalorder %s393_s12, 3 }
   0x4   : > { %p139_p2 = pnand %p337_p0, %p138_p1 }
   0x5   : > { %v382_v0 = vld [vmem:[%s450_s1] sm:$0xff] (!%p139_p2)   ;;  %v395_v1 = vmov (!%p139_p2), 0.0   ;;  %v383_v2 = vld [vmem:[%s450_s1 + $0x8] sm:$0xff] (!%p139_p2)   ;;  %vm396_vm0 = vmmov (!%p139_p2), 0   ;;  %s338_s18 = sshll.u32 (!%p139_p2), %s333_s13, 1  ;;  %v384_v3 = vld [vmem:[%s450_s1 + $0x10] sm:$0xff] (!%p139_p2)  }
   0x6   : > { %142 = sbr.rel (%p139_p2) target bundleno = 241 (0xf1), region = 32  ;;  %360 = vmatprep.subr.bf16.mxu0 (!%p139_p2), %v395_v1  ;;  %368 = vmatprep.mubr.msk.bf16.mxu0 (!%p139_p2), %vm396_vm0, %v395_v1  ;;  %p163_p3 = scmp.lt.s32.totalorder (!%p139_p2), %s338_s18, 3  ;;  %v385_v4 = vld [vmem:[%s450_s1 + $0x18] sm:$0xff] (!%p139_p2)   ;;  %vm221_vm1 = vcmask (!%p139_p2), 523264   ;;  %v342_v6 = vld [vmem:[%s451_s2] ss:$0 sm:$0xff] (!%p139_p2) }
   0x7   : > { %361 = vmatpush3.bf16.msra.mxu0 (!%p139_p2), %v382_v0  ;;  %vm274_vm2 = vcmask (!%p139_p2), 257024  }
   0x8   : > { %362 = vmatprep.subr.bf16.mxu0 (!%p139_p2), %v395_v1 }
   0xb   : > { %363 = vmatpush3.bf16.msra.mxu0 (!%p139_p2), %v383_v2 }
   0xc   : > { %364 = vmatprep.subr.bf16.mxu0 (!%p139_p2), %v395_v1 }
   0xd   : > { %s454_s18 = smov (!%p163_p3, %s338_s18), 3 }
   0xe   : > { %s339_s21 = sshll.u32 %s454_s18, 2 }
   0xf   : > { %s166_s24 = scalar_lea.vmem %s449_s0, %s339_s21  ;;  %365 = vmatpush3.bf16.msra.mxu0 %v384_v3  ;;  %s172_s4 = scalar_lea.vmem %s452_s3, %s339_s21 }
  0x10   : > { %366 = vmatprep.subr.bf16.mxu0 %v395_v1  ;;  %v386_v5 = vld [vmem:[%s166_s24] sm:$0xff]  }
  0x13   : > { %367 = vmatpush3.bf16.msra.mxu0 %v385_v4 }
  0x16   : > { %369 = vmatmul.mubr.msk.bf16.vlgmr.msra.gmra.mrb[0].mxu0 %vm221_vm1, %v386_v5 }
  0xe9   : > { %v259_v7 = vpop.f32.mrb[0].mxu0 }
  0xea   : > { %v260_v8 = vadd.f32 %v342_v6, %v259_v7  ;;  %v370_v9 = vpop.f32.mrb[1].mxu0 }
  0xeb   : > { %v262_v10 = vpop.f32.mrb[2].mxu0 }
  0xec   : > { %v353_v11 = vpack.c.bf16 %v260_v8, %v260_v8  ;;  %v263_v12 = vadd.f32 %v342_v6, %v262_v10  ;;  %v371_v13 = vpop.f32.mrb[3].mxu0 }
  0xee   : > { %275 = vst.msk [vmem:[%s172_s4] sm:$0xf] %vm274_vm2, %v353_v11  ;;  %v354_v14 = vpack.c.bf16 %v263_v12, %v263_v12 }
  0xf0   : > { %276 = vst.msk [vmem:[%s172_s4 + $0x4] sm:$0xf] %vm274_vm2, %v354_v14 }
  0xf1 PF: > { %s13_s12 = sadd.s32 1, %s393_s12  }
  0xf2   : > { %p10_p4 = scmp.ge.s32.totalorder %s13_s12, 4  }
  0xf4   :  { %12 = sbr.rel (!%p10_p4) target bundleno = 1 (0x1), region = 62 }

</bundles_post_ra>
